<compile_context>
chip_gen: v6e
topology: v6e:2x2x1
jax: 0.10.0
libtpu: 0.0.40
codegen_flags: <defaults>
</compile_context>

<pallas_src>
import jax
import jax.numpy as jnp
from jax.experimental import pallas as pl
from jax.experimental.pallas import tpu as pltpu

# ---- "args" (small, deterministic config) -----------------------------------
LATENT_DIM = 8
HIDDEN_DIM = 32
CONTROL_DIM = 16
TIMESTEPS = 8
IN_DIM = 4
BATCH_SIZE = 2
K_SHOT = 3

NUM_DYN_PARAMS = (HIDDEN_DIM * LATENT_DIM + HIDDEN_DIM
                  + LATENT_DIM * HIDDEN_DIM + LATENT_DIM)  # 552


# ---- Pallas kernel: batched hypernet-generated MLP (single invocation) -------
def dynamics_kernel(z_ref, w1_ref, b1_ref, w2_ref, b2_ref, o_ref):
    # Whole-array VMEM blocks (no grid): everything for all B samples at once.
    z = z_ref[...]        # [B, L]
    w1 = w1_ref[...]      # [B, H, L]   (PyTorch Linear layout: (out, in))
    b1 = b1_ref[...]      # [B, H]
    w2 = w2_ref[...]      # [B, L, H]
    b2 = b2_ref[...]      # [B, L]

    # Layer 1: h[b, j] = tanh( sum_i W1[b, j, i] * z[b, i] + b1[b, j] )
    # VPU broadcast-multiply + lane reduce (contraction lengths 8/32 are far
    # below the MXU systolic dimension, so keep it off the MXU).
    h = jnp.tanh(jnp.sum(w1 * z[:, None, :], axis=-1) + b1)      # [B, H]

    # Layer 2: o[b, k] = tanh( sum_j W2[b, k, j] * h[b, j] + b2[b, k] )
    o = jnp.tanh(jnp.sum(w2 * h[:, None, :], axis=-1) + b2)      # [B, L]

    # Single lane-contiguous store of the whole result.
    o_ref[...] = o.astype(o_ref.dtype)


def ode_forward_pallas(t, params, z):
    """Equivalent of ODE.forward(t, z) with self.params == params."""
    del t  # unused, matches the PyTorch wrapper signature
    B, L = z.shape
    H = HIDDEN_DIM

    # Unflatten per-sample parameter vectors (layout plumbing, PyTorch order:
    # W1[H,L], b1[H], W2[L,H], b2[L]).
    idx = 0
    w1 = params[:, idx:idx + H * L].reshape(B, H, L); idx += H * L
    b1 = params[:, idx:idx + H];                      idx += H
    w2 = params[:, idx:idx + L * H].reshape(B, L, H); idx += L * H
    b2 = params[:, idx:idx + L];                      idx += L

    vmem_spec = pl.BlockSpec(memory_space=pltpu.MemorySpace.VMEM)
    return pl.pallas_call(
        dynamics_kernel,
        out_shape=jax.ShapeDtypeStruct((B, L), z.dtype),
        in_specs=[vmem_spec] * 5,
        out_specs=vmem_spec,
    )(z, w1, b1, w2, b2)


# ---- sample_weights (domain encoder + hypernet) -- plain JAX glue ------------
def sample_weights(domains, controls, enc_w, enc_b, hyper_w, hyper_b):
    # domains: [B, K, T, in_dim]
    d = domains.reshape(BATCH_SIZE * K_SHOT, -1, IN_DIM)
    flat = d.reshape(d.shape[0], -1)                       # Flatten()
    emb = flat @ enc_w.T + enc_b                           # [B*K, control_dim]
    emb = emb.reshape(BATCH_SIZE, K_SHOT, CONTROL_DIM).mean(axis=1)
    emb = jnp.concatenate([emb, controls], axis=-1)        # [B, 2*control_dim]
    params = emb @ hyper_w.T + hyper_b                     # [B, num_dyn_params]
    return params


# ---- pure-JAX reference for the forward --------------------------------------
def ode_forward_ref(t, params, z):
    del t
    B, L = z.shape
    H = HIDDEN_DIM
    idx = 0
    w1 = params[:, idx:idx + H * L].reshape(B, H, L); idx += H * L
    b1 = params[:, idx:idx + H];                      idx += H
    w2 = params[:, idx:idx + L * H].reshape(B, L, H); idx += L * H
    b2 = params[:, idx:idx + L];                      idx += L

    def per_sample(w1_i, b1_i, w2_i, b2_i, z_i):
        h = jnp.tanh(z_i @ w1_i.T + b1_i)
        return jnp.tanh(h @ w2_i.T + b2_i)

    return jax.vmap(per_sample)(w1, b1, w2, b2, z)


if __name__ == "__main__":
    key = jax.random.PRNGKey(0)
    k_dom, k_ctl, k_z, k_ew, k_eb, k_hw = jax.random.split(key, 6)

    # Inputs
    domains = jax.random.normal(
        k_dom, (BATCH_SIZE, K_SHOT, TIMESTEPS, IN_DIM), dtype=jnp.float32)
    controls = jax.random.normal(
        k_ctl, (BATCH_SIZE, CONTROL_DIM), dtype=jnp.float32)
    z = jax.random.normal(k_z, (BATCH_SIZE, LATENT_DIM), dtype=jnp.float32)

    # Deterministic parameter init (mirrors the module's __init__ shapes)
    fan_in_enc = TIMESTEPS * IN_DIM
    bound = 1.0 / jnp.sqrt(fan_in_enc)
    enc_w = jax.random.uniform(k_ew, (CONTROL_DIM, fan_in_enc),
                               minval=-bound, maxval=bound, dtype=jnp.float32)
    enc_b = jax.random.uniform(k_eb, (CONTROL_DIM,),
                               minval=-bound, maxval=bound, dtype=jnp.float32)
    hyper_w = 0.01 * jax.random.normal(
        k_hw, (NUM_DYN_PARAMS, 2 * CONTROL_DIM), dtype=jnp.float32)
    hyper_b = jnp.zeros((NUM_DYN_PARAMS,), dtype=jnp.float32)

    # sample_weights -> per-sample flattened dynamics-network parameters
    params = sample_weights(domains, controls, enc_w, enc_b, hyper_w, hyper_b)

    # forward (Pallas kernel); jit fuses the wrapper-side slices/reshapes with
    # the pallas_call so no extra HBM copies of `params` materialize.
    t = jnp.float32(0.0)
    fwd = jax.jit(ode_forward_pallas)
    out = fwd(t, params, z)
    out = jax.block_until_ready(out)

    # correctness check vs pure-JAX reference
    ref = ode_forward_ref(t, params, z)
    assert out.shape == (BATCH_SIZE, LATENT_DIM)
    assert jnp.allclose(out, ref, rtol=1e-3, atol=1e-3), (out, ref)

    print("KERNEL_OK")
</pallas_src>

<mosaic_0001>
module attributes {stable_mosaic.version = 11 : i64} {
  func.func @dynamics_kernel(%arg0: memref<2x8xf32, #tpu.memory_space<vmem>>, %arg1: memref<2x32x8xf32, #tpu.memory_space<vmem>>, %arg2: memref<2x32xf32, #tpu.memory_space<vmem>>, %arg3: memref<2x8x32xf32, #tpu.memory_space<vmem>>, %arg4: memref<2x8xf32, #tpu.memory_space<vmem>>, %arg5: memref<2x8xf32, #tpu.memory_space<vmem>>) attributes {dimension_semantics = [], scalar_prefetch = 0 : i64, scratch_operands = 0 : i64, tpu.core_type = #tpu.core_type<tc>} {
    %c0 = arith.constant 0 : index
    %c0_0 = arith.constant 0 : index
    %0 = vector.load %arg0[%c0, %c0_0] : memref<2x8xf32, #tpu.memory_space<vmem>>, vector<2x8xf32>
    %c0_1 = arith.constant 0 : index
    %c0_2 = arith.constant 0 : index
    %c0_3 = arith.constant 0 : index
    %1 = vector.load %arg1[%c0_1, %c0_2, %c0_3] : memref<2x32x8xf32, #tpu.memory_space<vmem>>, vector<2x32x8xf32>
    %c0_4 = arith.constant 0 : index
    %c0_5 = arith.constant 0 : index
    %2 = vector.load %arg2[%c0_4, %c0_5] : memref<2x32xf32, #tpu.memory_space<vmem>>, vector<2x32xf32>
    %c0_6 = arith.constant 0 : index
    %c0_7 = arith.constant 0 : index
    %c0_8 = arith.constant 0 : index
    %3 = vector.load %arg3[%c0_6, %c0_7, %c0_8] : memref<2x8x32xf32, #tpu.memory_space<vmem>>, vector<2x8x32xf32>
    %c0_9 = arith.constant 0 : index
    %c0_10 = arith.constant 0 : index
    %4 = vector.load %arg4[%c0_9, %c0_10] : memref<2x8xf32, #tpu.memory_space<vmem>>, vector<2x8xf32>
    %5 = vector.shape_cast %0 : vector<2x8xf32> to vector<2x1x8xf32>
    %6 = vector.broadcast %5 : vector<2x1x8xf32> to vector<2x32x8xf32>
    %7 = arith.mulf %1, %6 : vector<2x32x8xf32>
    %cst = arith.constant dense<0.000000e+00> : vector<2x32xf32>
    %8 = vector.multi_reduction <add>, %7, %cst [2] : vector<2x32x8xf32> to vector<2x32xf32>
    %9 = arith.addf %8, %2 : vector<2x32xf32>
    %10 = math.tanh %9 : vector<2x32xf32>
    %11 = vector.shape_cast %10 : vector<2x32xf32> to vector<2x1x32xf32>
    %12 = vector.broadcast %11 : vector<2x1x32xf32> to vector<2x8x32xf32>
    %13 = arith.mulf %3, %12 : vector<2x8x32xf32>
    %cst_11 = arith.constant dense<0.000000e+00> : vector<2x8xf32>
    %14 = vector.multi_reduction <add>, %13, %cst_11 [2] : vector<2x8x32xf32> to vector<2x8xf32>
    %15 = arith.addf %14, %4 : vector<2x8xf32>
    %16 = math.tanh %15 : vector<2x8xf32>
    %c0_12 = arith.constant 0 : index
    %c0_13 = arith.constant 0 : index
    %17 = vector.load %arg5[%c0_12, %c0_13] : memref<2x8xf32, #tpu.memory_space<vmem>>, vector<2x8xf32>
    tpu.vector_store %arg5[%c0_12, %c0_13], %16 {strides = array<i32>} : memref<2x8xf32, #tpu.memory_space<vmem>>, vector<2x8xf32>,
    return
  }
}

</mosaic_0001>

<bundles_post_ra>
// kernel: ode_forward_pallas.1
= control target key start
LH: loop header
LB: loop body
LE: loop exit
PB: predicated region body
PF: predicated region fallthrough
CT: control target
= control target key end

     0   :  { %v46_v0 = vlaneseq  ;;  %v374_v2 = vmov 1966171168   ;;  %s490_s0 = inlined_call_operand.vmem [shape: f32[2,8], index: 0, kind: input, shape index: {}]   ;;  %s491_s1 = inlined_call_operand.vmem [shape: f32[2,32,8], index: 1, kind: input, shape index: {}]   ;;  %s492_s2 = inlined_call_operand.vmem [shape: f32[2,32], index: 2, kind: input, shape index: {}]   ;;  %s493_s3 = inlined_call_operand.vmem [shape: f32[2,8,32], index: 3, kind: input, shape index: {}]   ;;  %s494_s4 = inlined_call_operand.vmem [shape: f32[2,8], index: 4, kind: input, shape index: {}]   ;;  %s495_s5 = inlined_call_operand.hbm [shape: f32[2,8], index: 5, kind: output, shape index: {}]  }
   0x1   :  { %v326_v1 = vld.sshfl [vmem:[%s490_s0] sm:$0x11 pattern:$0x75316420]  ;;  %v44_v3 = vunpack.c.l.s4 %v374_v2 }
   0x2   :  { %v411_v4 = vshrl.u32 %v46_v0, 7 }
   0x3   :  { %10 = vsyncpa [#allocation3], 0  ;;  %v45_v5 = vunpack.c.0.s8 %v44_v3  ;;  %v42_v6 = vcombine.high %v326_v1, %v326_v1  ;;  %v22_v9 = vld [vmem:[%s491_s1] sm:$0xff]  ;;  %v23_v13 = vld [vmem:[%s491_s1 + $0x8] sm:$0xff]  ;;  %vm75_vm0 = vcmask 64512   ;;  %v375_v41 = vmov 0  }
   0x4   :  { %v415_v8 = vsub.s32 0, %v411_v4  ;;  %v26_v12 = vld [vmem:[%s491_s1 + $0x20] sm:$0xff]  ;;  %v27_v14 = vld [vmem:[%s491_s1 + $0x28] sm:$0xff]  ;;  %v24_v21 = vld [vmem:[%s491_s1 + $0x10] sm:$0xff]  ;;  %v122_v39 = vsub.s32 1, %v411_v4  ;;  %330 = vset.pattern.permute.xlu0 %v375_v41  ;;  %331 = vset.pattern.permute.xlu1 %v375_v41  ;;  %vm206_vm1 = vcmask 130112  }
   0x5   :  { %v48_v7 = vsub.s32 %v45_v5, %v411_v4  ;;  %v28_v22 = vld [vmem:[%s491_s1 + $0x30] sm:$0xff]  ;;  %v25_v29 = vld [vmem:[%s491_s1 + $0x18] sm:$0xff]  ;;  %v30_v37 = vld [vmem:[%s492_s2] sm:$0x3]  ;;  %vm213_vm2 = vcmask 195712   ;;  %vm220_vm3 = vcmask 261312  }
   0x6   :  { %v29_v30 = vld [vmem:[%s491_s1 + $0x38] sm:$0xff]  ;;  %v104_v38 = vrot.slane %v30_v37, %v415_v8  ;;  %v123_v40 = vrot.slane %v30_v37, %v122_v39  ;;  %vm264_vm4 = vcmask 261120   ;;  %vm241_vm5 = vcmask 1041409  }
   0x7   :  { %v49_v10 = vrot.slane %v326_v1, %v48_v7  ;;  %v56_v11 = vrot.slane %v42_v6, %v48_v7  ;;  %vm310_vm6 = vcmask 58368  }
   0x9   :  { %v60_v15 = vrot.slane %v49_v10, %v415_v8  ;;  %v64_v16 = vrot.slane %v56_v11, %v415_v8 }
   0xb   :  { %v67_v17 = vmul.f32 %v60_v15, %v22_v9  ;;  %v71_v18 = vmul.f32 %v64_v16, %v26_v12  ;;  %v68_v19 = vmul.f32 %v60_v15, %v23_v13  ;;  %v72_v20 = vmul.f32 %v64_v16, %v27_v14 }
   0xc   :  { %v69_v27 = vmul.f32 %v60_v15, %v24_v21  ;;  %v73_v28 = vmul.f32 %v64_v16, %v28_v22  ;;  %v70_v33 = vmul.f32 %v60_v15, %v25_v29  ;;  %v74_v34 = vmul.f32 %v64_v16, %v29_v30 }
   0xd   :  { %v76_v23 = vsel %vm75_vm0, %v67_v17, 0.0  ;;  %v88_v24 = vsel %vm75_vm0, %v71_v18, 0.0  ;;  %v79_v25 = vsel %vm75_vm0, %v68_v19, 0.0  ;;  %v91_v26 = vsel %vm75_vm0, %v72_v20, 0.0 }
   0xe   :  { %77 = vadd.xlane.f32.xlu0 %v76_v23  ;;  %89 = vadd.xlane.f32.xlu1 %v88_v24  ;;  %v82_v31 = vsel %vm75_vm0, %v69_v27, 0.0  ;;  %v94_v32 = vsel %vm75_vm0, %v73_v28, 0.0  ;;  %v85_v35 = vsel %vm75_vm0, %v70_v33, 0.0  ;;  %v97_v36 = vsel %vm75_vm0, %v74_v34, 0.0  ;;  %v31_v33 = vld [vmem:[%s493_s3] sm:$0xff] }
   0xf   :  { %v196_v13 = vand.u32 127, %v46_v0 }
  0x11   :  { %v201_v15 = vadd.s32 4294967288, %v196_v13  ;;  %v208_v16 = vadd.s32 4294967280, %v196_v13  ;;  %v460_v19 = vsub.s32 %v196_v13, %v411_v4  ;;  %v215_v21 = vadd.s32 4294967272, %v196_v13 }
  0x12   :  { %80 = vadd.xlane.f32.xlu0 %v79_v25  ;;  %92 = vadd.xlane.f32.xlu1 %v91_v26 }
  0x13   :  { %v204_v20 = vsub.s32 %v201_v15, %v411_v4  ;;  %v211_v22 = vsub.s32 %v208_v16, %v411_v4  ;;  %v218_v0 = vsub.s32 %v215_v21, %v411_v4 }
  0x16   :  { %83 = vadd.xlane.f32.xlu0 %v82_v31  ;;  %95 = vadd.xlane.f32.xlu1 %v94_v32 }
  0x1a   :  { %86 = vadd.xlane.f32.xlu0 %v85_v35  ;;  %98 = vadd.xlane.f32.xlu1 %v97_v36 }
  0x2b   :  { %110 = vbcast.lane.b32.xlu1 %v104_v38, 264 }
  0x2f   :  { %125 = vbcast.lane.b32.xlu1 %v123_v40, 256 }
  0x30   :  { %106 = vbcast.lane.b32.xlu0 %v104_v38, 256 }
  0x33   :  { %129 = vbcast.lane.b32.xlu1 %v123_v40, 264 }
  0x34   :  { %114 = vbcast.lane.b32.xlu0 %v104_v38, 272 }
  0x37   :  { %133 = vbcast.lane.b32.xlu1 %v123_v40, 272 }
  0x38   :  { %118 = vbcast.lane.b32.xlu0 %v104_v38, 280 }
  0x3b   :  { %137 = vbcast.lane.b32.xlu1 %v123_v40, 280 }
  0x97   :  { %v78_v42 = vpop.xlane.xlu0 %77  ;;  %v90_v43 = vpop.xlane.xlu1 %89 }
  0x9b   :  { %v81_v44 = vpop.xlane.xlu0 %80  ;;  %v93_v45 = vpop.xlane.xlu1 %92 }
  0x9f   :  { %v84_v46 = vpop.xlane.xlu0 %83  ;;  %v96_v47 = vpop.xlane.xlu1 %95 }
  0xa3   :  { %v87_v48 = vpop.xlane.xlu0 %86  ;;  %v99_v49 = vpop.xlane.xlu1 %98 }
  0xa7   :  { %v107_v50 = vpop.permute.xlu0 %106  ;;  %v111_v51 = vpop.permute.xlu1 %110 }
  0xa8   :  { %v147_v52 = vadd.f32 %v107_v50, %v78_v42  ;;  %v148_v53 = vadd.f32 %v111_v51, %v81_v44 }
  0xaa   :  { %332 = vtanh.f32 %v147_v52 }
  0xab   :  { %334 = vtanh.f32 %v148_v53  ;;  %v115_v54 = vpop.permute.xlu0 %114  ;;  %v126_v55 = vpop.permute.xlu1 %125 }
  0xac   :  { %v151_v56 = vadd.f32 %v126_v55, %v90_v43  ;;  %v149_v57 = vadd.f32 %v115_v54, %v84_v46  ;;  %v32_v43 = vld [vmem:[%s493_s3 + $0x8] sm:$0xff]  ;;  %s376_s3 = smov [#allocation2]  }
  0xae   :  { %336 = vtanh.f32 %v151_v56 }
  0xaf   :  { %v130_v58 = vpop.permute.xlu1 %129  ;;  %v119_v59 = vpop.permute.xlu0 %118  ;;  %338 = vtanh.f32 %v149_v57 }
  0xb0   :  { %v152_v60 = vadd.f32 %v130_v58, %v93_v45  ;;  %v150_v61 = vadd.f32 %v119_v59, %v87_v48 }
  0xb2   :  { %340 = vtanh.f32 %v152_v60 }
  0xb3   :  { %v134_v62 = vpop.permute.xlu1 %133 }
  0xb4   :  { %v153_v63 = vadd.f32 %v134_v62, %v96_v47 }
  0xb6   :  { %342 = vtanh.f32 %v153_v63 }
  0xb7   :  { %v333_v1 = vpop.eup %332  ;;  %344 = vtanh.f32 %v150_v61  ;;  %v138_v2 = vpop.permute.xlu1 %137 }
  0xb8   :  { %v335_v3 = vpop.eup %334  ;;  %v154_v5 = vadd.f32 %v138_v2, %v99_v49  ;;  %172 = vperm.xlu0 %330, %v333_v1   ;;  %v33_v49 = vld [vmem:[%s494_s4] sm:$0x3]  ;;  %s318_s4 = sshll.u32 %s376_s3, 4  ;;  %s319_s4 = int_to_ptr.vmem [resolvable:$true] %s318_s4 }
  0xb9   :  { %175 = vperm.xlu1 %331, %v335_v3   ;;  %v282_v50 = vrot.slane %v33_v49, %v122_v39  ;;  %v275_v51 = vrot.slane %v33_v49, %v415_v8  ;;  %s352_s16 = scalar_lea.vmem %s319_s4, 32  ;;  %p357_p1 = scmp.lt.s32.totalorder %s319_s4, %s319_s4 }
  0xba   :  { %346 = vtanh.f32 %v154_v5  ;;  %p353_p0 = scmp.ne.s32.totalorder %s319_s4, %s352_s16  ;;  %p358_p2 = scmp.lt.s32.totalorder %s352_s16, %s352_s16 }
  0xbb   :  { %v337_v6 = vpop.eup %336 }
  0xbc   :  { %v339_v7 = vpop.eup %338  ;;  %p359_p3 = por %p358_p2, %p357_p1 }
  0xbd   :  { %184 = vperm.xlu1 %331, %v337_v6  }
  0xbe   :  { %p360_p4 = pnand %p359_p3, %p353_p0 }
  0xbf   :  { %v341_v9 = vpop.eup %340 }
  0xc0   :  { %187 = vperm.xlu0 %330, %v341_v9  }
  0xc1   :  { %178 = vperm.xlu1 %331, %v339_v7  }
  0xc3   :  { %v343_v10 = vpop.eup %342 }
  0xc4   :  { %v345_v11 = vpop.eup %344  ;;  %190 = vperm.xlu0 %330, %v343_v10  }
  0xc5   :  { %181 = vperm.xlu1 %331, %v345_v11  }
  0xc7   :  { %v347_v12 = vpop.eup %346 }
  0xc8   :  { %193 = vperm.xlu0 %330, %v347_v12  }
 0x133   :  { %v173_v17 = vpop.permute.xlu0 %172 }
 0x134   :  { %v176_v14 = vpop.permute.xlu1 %175  ;;  %v200_v25 = vrot.slane %v173_v17, %v460_v19 }
 0x135   :  { %v205_v26 = vrot.slane %v176_v14, %v204_v20 }
 0x137   :  { %v207_v30 = vsel %vm206_vm1, %v205_v26, %v200_v25 }
 0x138   :  { %v185_v18 = vpop.permute.xlu1 %184 }
 0x139   :  { %v225_v36 = vrot.slane %v185_v18, %v460_v19 }
 0x13b   :  { %v188_v23 = vpop.permute.xlu0 %187 }
 0x13c   :  { %v179_v24 = vpop.permute.xlu1 %178  ;;  %v229_v31 = vrot.slane %v188_v23, %v204_v20 }
 0x13d   :  { %v212_v27 = vrot.slane %v179_v24, %v211_v22 }
 0x13e   :  { %v230_v41 = vsel %vm206_vm1, %v229_v31, %v225_v36 }
 0x13f   :  { %v191_v28 = vpop.permute.xlu0 %190  ;;  %v214_v34 = vsel %vm213_vm2, %v212_v27, %v207_v30 }
 0x140   :  { %v182_v29 = vpop.permute.xlu1 %181  ;;  %v234_v35 = vrot.slane %v191_v28, %v211_v22 }
 0x141   :  { %v219_v32 = vrot.slane %v182_v29, %v218_v0 }
 0x142   :  { %v235_v44 = vsel %vm213_vm2, %v234_v35, %v230_v41 }
 0x143   :  { %v221_v37 = vsel %vm220_vm3, %v219_v32, %v214_v34  ;;  %v194_v38 = vpop.permute.xlu0 %193 }
 0x144   :  { %v262_v40 = vmul.f32 %v221_v37, %v31_v33  ;;  %v239_v42 = vrot.slane %v194_v38, %v218_v0 }
 0x146   :  { %v265_v45 = vsel %vm264_vm4, %v262_v40, 0.0  ;;  %v240_v46 = vsel %vm220_vm3, %v239_v42, %v235_v44 }
 0x147   :  { %266 = vadd.xlane.f32.xlu1 %v265_v45  ;;  %v263_v47 = vmul.f32 %v240_v46, %v32_v43 }
 0x149   :  { %v268_v48 = vsel %vm264_vm4, %v263_v47, 0.0 }
 0x14a   :  { %269 = vadd.xlane.f32.xlu0 %v268_v48 }
 0x158   :  { %284 = vbcast.lane.b32.xlu1 %v282_v50, 256 }
 0x160   :  { %277 = vbcast.lane.b32.xlu0 %v275_v51, 256 }
 0x1d0   :  { %v267_v52 = vpop.xlane.xlu1 %266 }
 0x1d3   :  { %v270_v53 = vpop.xlane.xlu0 %269 }
 0x1d4   :  { %v285_v54 = vpop.permute.xlu1 %284 }
 0x1d5   :  { %v289_v55 = vadd.f32 %v285_v54, %v270_v53 }
 0x1d7   :  { %348 = vtanh.f32 %v289_v55  ;;  %v278_v56 = vpop.permute.xlu0 %277 }
 0x1d8   :  { %v288_v57 = vadd.f32 %v278_v56, %v267_v52 }
 0x1da   :  { %350 = vtanh.f32 %v288_v57 }
 0x1e4   :  { %v349_v58 = vpop.eup %348 }
 0x1e5   :  { %298 = vperm.xlu0 %330, %v349_v58  }
 0x1e7   :  { %v351_v59 = vpop.eup %350 }
 0x1e8   :  { %295 = vperm.xlu1 %331, %v351_v59  }
 0x260   :  { %v299_v60 = vpop.permute.xlu0 %298 }
 0x261   :  { %v307_v8 = vrot.slane %v299_v60, %v460_v19 }
 0x263   :  { %v296_v4 = vpop.permute.xlu1 %295 }
 0x264   :  { %v303_v39 = vrot.slane %v296_v4, %v460_v19 }
 0x266   :  { %v308_v61 = vsel %vm241_vm5, %v307_v8, %v303_v39 }
 0x267   :  { %311 = vst.msk [vmem:[#allocation2] sm:$0x3] %vm310_vm6, %v308_v61 }
 0x268   :  { %363 = shalt.err (!%p360_p4)
}
 0x269   :  { %321 = dma.vmem_to_hbm [thread:$0]  %s319_s4, 32, %s495_s5, [#allocation3]  }
 0x26a   :  { %372 = dma.done.wait [#allocation3], 32  }
 0x26b   :  { %373 = vsyncadd [#allocation3], 4294967264 }
 0x26c   :  { %325 = vsyncpa [#allocation3], 1 }

</bundles_post_ra>
